<compile_context>
chip_gen: v5e
topology: v5e:2x2
jax: 0.10.0
libtpu: 0.0.40
codegen_flags: <defaults>
</compile_context>

<pallas_src>
import functools

import jax
import jax.numpy as jnp
from jax import lax
from jax.experimental import pallas as pl
from jax.experimental.pallas import tpu as pltpu


def _round_up(x, m):
    return ((x + m - 1) // m) * m


def _default_num_splits():
    """2-way 'parallel' batch split only on multi-TensorCore chips; else 1."""
    try:
        dev = jax.devices()[0]
        n_cores = int(getattr(dev, "num_cores", 1) or 1)
        return 2 if n_cores >= 2 else 1
    except Exception:
        return 1


def _focal_loss_kernel(logits_ref, tgt_ref, out_ref, acc_ref, *, gamma, n_valid):
    """Processes one (TN, C) logits tile + (TN, 1) target tile.

    Grid = (num_splits, blocks_per_split): the leading axis is 'parallel'
    (per-core partial sums on multi-TC chips), the trailing axis streams the
    batch. acc_ref is a (TN, 1) f32 scratch of per-row partial sums; the
    cross-sublane reduction and divide-by-N happen only on the last streaming
    step of each split.
    """
    c = pl.program_id(0)
    i = pl.program_id(1)
    num_i = pl.num_programs(1)

    @pl.when(i == 0)
    def _():
        acc_ref[...] = jnp.zeros_like(acc_ref)

    x = logits_ref[...].astype(jnp.float32)                   # (TN, C)
    tgt = tgt_ref[...]                                        # (TN, 1) int32
    tn = x.shape[0]

    # Numerically-stable log-sum-exp pieces.
    m = jnp.max(x, axis=-1, keepdims=True)                    # (TN, 1)
    s = jnp.sum(jnp.exp(x - m), axis=-1, keepdims=True)       # (TN, 1)

    # Target logit via masked select + lane reduction (no dynamic gather on TPU).
    col = lax.broadcasted_iota(jnp.int32, x.shape, 1)
    picked = jnp.sum(jnp.where(col == tgt, x, 0.0), axis=-1, keepdims=True)

    ce = (m - picked) + jnp.log(s)                             # per-sample CE >= 0
    pt = jnp.exp(-ce)                                          # per-row EUP exp (cheap slot)
    t = jnp.maximum(1.0 - pt, 0.0)                             # clamp rounding negatives
    if float(gamma) == 2.0:
        w = t * t                                              # single VPU multiply
    elif float(gamma).is_integer() and gamma >= 0.0:
        w = lax.integer_pow(t, int(gamma))
    else:
        # Guard pow(0, gamma) -> exp(gamma * log(0)) NaN on some lowerings.
        w = jnp.where(t > 0.0,
                      jnp.power(jnp.maximum(t, 1e-30), jnp.float32(gamma)),
                      0.0)
    focal = w * ce                                             # (TN, 1)

    # Mask ragged-boundary rows (their data is undefined) BEFORE accumulating;
    # jnp.where's select does not propagate NaN from the discarded branch.
    row = (c * num_i + i) * tn + lax.broadcasted_iota(jnp.int32, (tn, 1), 0)
    focal = jnp.where(row < n_valid, focal, 0.0)

    acc_ref[...] += focal

    @pl.when(i == num_i - 1)
    def _():
        out_ref[...] = (
            jnp.sum(acc_ref[...], axis=(0, 1), keepdims=True) / jnp.float32(n_valid)
        )


def focal_loss(logits, targets, gamma=2.0, *, num_splits=None,
               target_block_bytes=4 * 1024 * 1024,
               vmem_limit_bytes=48 * 1024 * 1024):
    """logits: [N, C] float, targets: [N] int class indices -> scalar mean focal loss."""
    N, C = logits.shape
    itemsize = jnp.dtype(logits.dtype).itemsize
    # Sublane packing: f32 rows pack 8/vreg tile, bf16 16, int8/fp8 32.
    row_align = 8 * max(1, 4 // itemsize)

    if num_splits is None:
        num_splits = _default_num_splits()
    num_splits = max(1, int(num_splits))

    # Byte-targeted batch tile: ~target_block_bytes of logits per buffer,
    # capped at 8192 rows and at what this N / split actually needs.
    row_bytes = max(1, C * itemsize)
    cap = max(row_align, (target_block_bytes // row_bytes) // row_align * row_align)
    need = _round_up(max(1, pl.cdiv(N, num_splits)), row_align)
    tile_n = max(row_align, min(8192, cap, need))
    if tile_n >= N:
        tile_n = N            # single full-extent batch block (always a legal block)

    num_blocks = pl.cdiv(N, tile_n)
    num_splits = min(num_splits, num_blocks)
    blocks_per_split = pl.cdiv(num_blocks, num_splits)

    def block_idx(c, i):
        # Clamp so a split's tail never issues a fully out-of-bounds DMA; the
        # in-kernel row mask zeroes any ragged / re-read rows.
        return (jnp.minimum(c * blocks_per_split + i, num_blocks - 1), 0)

    tgt2d = targets.astype(jnp.int32).reshape(N, 1)

    kernel = functools.partial(_focal_loss_kernel, gamma=float(gamma), n_valid=N)
    cost = pl.CostEstimate(
        flops=int(5 * N * C + 8 * N),
        transcendentals=int(N * C + 2 * N),
        bytes_accessed=int(N * C * itemsize + N * 4 + num_splits * 4),
    )

    partials = pl.pallas_call(
        kernel,
        out_shape=jax.ShapeDtypeStruct((num_splits, 1), jnp.float32),
        grid_spec=pltpu.PrefetchScalarGridSpec(
            num_scalar_prefetch=0,
            grid=(num_splits, blocks_per_split),
            in_specs=[
                pl.BlockSpec((tile_n, C), block_idx),
                pl.BlockSpec((tile_n, 1), block_idx),
            ],
            out_specs=pl.BlockSpec((1, 1), lambda c, i: (c, 0)),
            scratch_shapes=[pltpu.VMEM((tile_n, 1), jnp.float32)],
        ),
        compiler_params=pltpu.CompilerParams(
            dimension_semantics=("parallel", "arbitrary"),
            vmem_limit_bytes=vmem_limit_bytes,
        ),
        cost_estimate=cost,
    )(logits, tgt2d)

    return jnp.sum(partials)


def focal_loss_ref(logits, targets, gamma=2.0):
    """Pure-JAX reference matching F.cross_entropy(reduction='none') + focal."""
    lse = jax.nn.logsumexp(logits, axis=-1)
    picked = jnp.take_along_axis(logits, targets[:, None], axis=-1)[:, 0]
    ce = lse - picked
    pt = jnp.exp(-ce)
    return jnp.mean((1.0 - pt) ** gamma * ce)


if __name__ == "__main__":
    key = jax.random.PRNGKey(0)
    k1, k2, k3, k4 = jax.random.split(key, 4)

    # Case 1: small batch of class logits.
    N, C = 16, 32
    logits = jax.random.normal(k1, (N, C), dtype=jnp.float32)
    targets = jax.random.randint(k2, (N,), 0, C, dtype=jnp.int32)
    out = jax.block_until_ready(focal_loss(logits, targets, gamma=2.0))
    ref = focal_loss_ref(logits, targets, gamma=2.0)
    assert jnp.allclose(out, ref, rtol=1e-5, atol=1e-5), (out, ref)

    # Case 2: ragged batch + non-multiple-of-128 class count (no padding anywhere).
    N2, C2 = 13, 10
    logits2 = jax.random.normal(k3, (N2, C2), dtype=jnp.float32)
    targets2 = jax.random.randint(k4, (N2,), 0, C2, dtype=jnp.int32)
    out2 = jax.block_until_ready(focal_loss(logits2, targets2, gamma=2.0))
    ref2 = focal_loss_ref(logits2, targets2, gamma=2.0)
    assert jnp.allclose(out2, ref2, rtol=1e-5, atol=1e-5), (out2, ref2)

    print("KERNEL_OK")
</pallas_src>

<mosaic_0001>
module attributes {stable_mosaic.version = 11 : i64} {
  func.func @_focal_loss_kernel(%arg0: i32, %arg1: i32, %arg2: memref<16x32xf32, #tpu.memory_space<vmem>>, %arg3: memref<16x1xi32, #tpu.memory_space<vmem>>, %arg4: memref<1x1xf32, #tpu.memory_space<vmem>>, %arg5: memref<16x1xf32, #tpu.memory_space<vmem>>) attributes {dimension_semantics = [#tpu.dimension_semantics<parallel>, #tpu.dimension_semantics<arbitrary>], iteration_bounds = array<i64: 1, 1>, scalar_prefetch = 0 : i64, scratch_operands = 1 : i64, tpu.core_type = #tpu.core_type<tc>, window_params = [{transform_indices = @transform_0, window_bounds = array<i64: 16, 32>}, {transform_indices = @transform_1, window_bounds = array<i64: 16, 1>}, {transform_indices = @transform_2, window_bounds = array<i64: 1, 1>}]} {
    %c0_i32 = arith.constant 0 : i32
    %0 = arith.cmpi eq, %arg1, %c0_i32 : i32
    %1 = arith.extui %0 : i1 to i32
    %c0_i32_0 = arith.constant 0 : i32
    %2 = arith.cmpi ne, %1, %c0_i32_0 : i32
    scf.if %2 {
      %cst_18 = arith.constant 0.000000e+00 : f32
      %47 = vector.broadcast %cst_18 : f32 to vector<16x1xf32>
      %c0_19 = arith.constant 0 : index
      %c0_20 = arith.constant 0 : index
      %48 = vector.load %arg5[%c0_19, %c0_20] : memref<16x1xf32, #tpu.memory_space<vmem>>, vector<16x1xf32>
      tpu.vector_store %arg5[%c0_19, %c0_20], %47 {strides = array<i32>} : memref<16x1xf32, #tpu.memory_space<vmem>>, vector<16x1xf32>,
    } else {
    }
    %c0 = arith.constant 0 : index
    %c0_1 = arith.constant 0 : index
    %3 = vector.load %arg2[%c0, %c0_1] : memref<16x32xf32, #tpu.memory_space<vmem>>, vector<16x32xf32>
    %c0_2 = arith.constant 0 : index
    %c0_3 = arith.constant 0 : index
    %4 = vector.load %arg3[%c0_2, %c0_3] : memref<16x1xi32, #tpu.memory_space<vmem>>, vector<16x1xi32>
    %cst = arith.constant dense<0xFF800000> : vector<16xf32>
    %5 = vector.multi_reduction <maximumf>, %3, %cst [1] : vector<16x32xf32> to vector<16xf32>
    %6 = vector.shape_cast %5 : vector<16xf32> to vector<16x1xf32>
    %7 = vector.broadcast %6 : vector<16x1xf32> to vector<16x32xf32>
    %8 = arith.subf %3, %7 : vector<16x32xf32>
    %9 = math.exp %8 : vector<16x32xf32>
    %cst_4 = arith.constant dense<0.000000e+00> : vector<16xf32>
    %10 = vector.multi_reduction <add>, %9, %cst_4 [1] : vector<16x32xf32> to vector<16xf32>
    %11 = vector.shape_cast %10 : vector<16xf32> to vector<16x1xf32>
    %12 = tpu.iota {dimensions = array<i32: 1>} : vector<16x32xi32>
    %13 = vector.broadcast %4 : vector<16x1xi32> to vector<16x32xi32>
    %14 = arith.cmpi eq, %12, %13 : vector<16x32xi32>
    %cst_5 = arith.constant 0.000000e+00 : f32
    %15 = vector.broadcast %cst_5 : f32 to vector<16x32xf32>
    %16 = arith.select %14, %3, %15 : vector<16x32xi1>, vector<16x32xf32>
    %cst_6 = arith.constant dense<0.000000e+00> : vector<16xf32>
    %17 = vector.multi_reduction <add>, %16, %cst_6 [1] : vector<16x32xf32> to vector<16xf32>
    %18 = vector.shape_cast %17 : vector<16xf32> to vector<16x1xf32>
    %19 = arith.subf %6, %18 : vector<16x1xf32>
    %20 = math.log %11 : vector<16x1xf32>
    %21 = arith.addf %19, %20 : vector<16x1xf32>
    %cst_7 = arith.constant 0.000000e+00 : f32
    %22 = vector.broadcast %cst_7 : f32 to vector<16x1xf32>
    %23 = arith.subf %22, %21 : vector<16x1xf32>
    %24 = math.exp %23 : vector<16x1xf32>
    %cst_8 = arith.constant 1.000000e+00 : f32
    %25 = vector.broadcast %cst_8 : f32 to vector<16x1xf32>
    %26 = arith.subf %25, %24 : vector<16x1xf32>
    %cst_9 = arith.constant 0.000000e+00 : f32
    %27 = vector.broadcast %cst_9 : f32 to vector<16x1xf32>
    %28 = arith.maximumf %26, %27 : vector<16x1xf32>
    %29 = arith.mulf %28, %28 : vector<16x1xf32>
    %30 = arith.mulf %29, %21 : vector<16x1xf32>
    %c1_i32 = arith.constant 1 : i32
    %31 = arith.muli %arg0, %c1_i32 : i32
    %32 = arith.addi %31, %arg1 : i32
    %c16_i32 = arith.constant 16 : i32
    %33 = arith.muli %32, %c16_i32 : i32
    %34 = tpu.iota {dimensions = array<i32: 0>} : vector<16x1xi32>
    %35 = vector.broadcast %33 : i32 to vector<16x1xi32>
    %36 = arith.addi %35, %34 : vector<16x1xi32>
    %c16_i32_10 = arith.constant 16 : i32
    %37 = vector.broadcast %c16_i32_10 : i32 to vector<16x1xi32>
    %38 = arith.cmpi slt, %36, %37 : vector<16x1xi32>
    %cst_11 = arith.constant 0.000000e+00 : f32
    %39 = vector.broadcast %cst_11 : f32 to vector<16x1xf32>
    %40 = arith.select %38, %30, %39 : vector<16x1xi1>, vector<16x1xf32>
    %c0_12 = arith.constant 0 : index
    %c0_13 = arith.constant 0 : index
    %41 = vector.load %arg5[%c0_12, %c0_13] : memref<16x1xf32, #tpu.memory_space<vmem>>, vector<16x1xf32>
    %42 = arith.addf %41, %40 : vector<16x1xf32>
    %c0_14 = arith.constant 0 : index
    %c0_15 = arith.constant 0 : index
    %43 = vector.load %arg5[%c0_14, %c0_15] : memref<16x1xf32, #tpu.memory_space<vmem>>, vector<16x1xf32>
    tpu.vector_store %arg5[%c0_14, %c0_15], %42 {strides = array<i32>} : memref<16x1xf32, #tpu.memory_space<vmem>>, vector<16x1xf32>,
    %c0_i32_16 = arith.constant 0 : i32
    %44 = arith.cmpi eq, %arg1, %c0_i32_16 : i32
    %45 = arith.extui %44 : i1 to i32
    %c0_i32_17 = arith.constant 0 : i32
    %46 = arith.cmpi ne, %45, %c0_i32_17 : i32
    scf.if %46 {
      %c0_18 = arith.constant 0 : index
      %c0_19 = arith.constant 0 : index
      %47 = vector.load %arg5[%c0_18, %c0_19] : memref<16x1xf32, #tpu.memory_space<vmem>>, vector<16x1xf32>
      %48 = vector.shape_cast %47 : vector<16x1xf32> to vector<1x16x1xf32>
      %cst_20 = arith.constant dense<0.000000e+00> : vector<1xf32>
      %49 = vector.multi_reduction <add>, %48, %cst_20 [1, 2] : vector<1x16x1xf32> to vector<1xf32>
      %50 = vector.shape_cast %49 : vector<1xf32> to vector<1x1x1xf32>
      %51 = vector.extract %50[0, 0, 0] : f32 from vector<1x1x1xf32>
      %52 = vector.broadcast %51 : f32 to vector<1x1xf32>
      %cst_21 = arith.constant 1.600000e+01 : f32
      %53 = vector.broadcast %cst_21 : f32 to vector<1x1xf32>
      %54 = arith.divf %52, %53 : vector<1x1xf32>
      %c0_22 = arith.constant 0 : index
      %c0_23 = arith.constant 0 : index
      %55 = vector.load %arg4[%c0_22, %c0_23] : memref<1x1xf32, #tpu.memory_space<vmem>>, vector<1x1xf32>
      tpu.vector_store %arg4[%c0_22, %c0_23], %54 {strides = array<i32>} : memref<1x1xf32, #tpu.memory_space<vmem>>, vector<1x1xf32>,
    } else {
    }
    return
  }
  func.func @transform_0(%arg0: i32, %arg1: i32) -> (i32, i32) {
    %c1_i32 = arith.constant 1 : i32
    %0 = arith.muli %arg0, %c1_i32 : i32
    %1 = arith.addi %0, %arg1 : i32
    %c0_i32 = arith.constant 0 : i32
    %2 = arith.minsi %1, %c0_i32 : i32
    %c0_i32_0 = arith.constant 0 : i32
    %c0_i32_1 = arith.constant 0 : i32
    return %2, %c0_i32_0 : i32, i32
  }
  func.func @transform_1(%arg0: i32, %arg1: i32) -> (i32, i32) {
    %c1_i32 = arith.constant 1 : i32
    %0 = arith.muli %arg0, %c1_i32 : i32
    %1 = arith.addi %0, %arg1 : i32
    %c0_i32 = arith.constant 0 : i32
    %2 = arith.minsi %1, %c0_i32 : i32
    %c0_i32_0 = arith.constant 0 : i32
    %c0_i32_1 = arith.constant 0 : i32
    return %2, %c0_i32_0 : i32, i32
  }
  func.func @transform_2(%arg0: i32, %arg1: i32) -> (i32, i32) {
    %c0_i32 = arith.constant 0 : i32
    %c0_i32_0 = arith.constant 0 : i32
    return %arg0, %c0_i32 : i32, i32
  }
}

</mosaic_0001>

<bundles_post_ra>
// kernel: tpu_custom_call.1
= control target key start
LH: loop header
LB: loop body
LE: loop exit
PB: predicated region body
PF: predicated region fallthrough
CT: control target
= control target key end

     0   :  { %vm87_vm0 = vcmask 261120   ;;  %v269_v2 = vmov 0   ;;  %s315_s0 = inlined_call_operand.vmem [shape: f32[16,32], index: 0, kind: input, shape index: {}]   ;;  %s316_s1 = inlined_call_operand.vmem [shape: s32[16,1], index: 1, kind: input, shape index: {}]   ;;  %s317_s2 = inlined_call_operand.hbm [shape: f32[1,1], index: 2, kind: output, shape index: {}]  }
   0x1   :  { %v85_v0 = vld [vmem:[%s316_s1] sm:$0xff]  ;;  %227 = vset.pattern.permute.xlu1 %v269_v2  ;;  %228 = vset.pattern.permute.xlu0 %v269_v2 }
   0x2   :  { %v83_v1 = vld [vmem:[%s315_s0] sm:$0xff] }
   0x3   :  { %v88_v3 = vsel %vm87_vm0, %v83_v1, -inf }
   0x4   :  { %7 = vsyncpa [#allocation4], 0  ;;  %109 = vperm.xlu1 %227, %v85_v0   ;;  %89 = vmax.xlane.f32.xlu0 %v88_v3  ;;  %v84_v4 = vld [vmem:[%s315_s0 + $0x8] sm:$0xff]  ;;  %v106_v7 = vlaneseq  ;;  %vm80_vm3 = vcmask 7168   ;;  %v270_v25 = vmov 0.0   ;;  %s272_s0 = smov [#allocation3]  }
   0x5   :  { %v86_v5 = vld [vmem:[%s316_s1 + $0x8] sm:$0xff]  ;;  %v91_v6 = vsel %vm87_vm0, %v84_v4, -inf  ;;  %81 = vst.msk [vmem:[#allocation2] sm:$0xff] %vm80_vm3, %v270_v25  ;;  %s198_s1 = sshll.u32 %s272_s0, 4  ;;  %s200_s19 = sshll.u32 %s317_s2, 4  ;;  %vm191_vm5 = vcmask 0   ;;  %s199_s1 = int_to_ptr.vmem [resolvable:$true] %s198_s1  ;;  %s201_s19 = int_to_ptr.hbm [resolvable:$true] %s200_s19 }
   0x6   :  { %v107_v8 = vand.u32 127, %v106_v7  ;;  %82 = vst.msk [vmem:[#allocation2 + $0x8] sm:$0xff] %vm80_vm3, %v270_v25 }
   0xc   :  { %112 = vperm.xlu1 %227, %v86_v5   ;;  %92 = vmax.xlane.f32.xlu0 %v91_v6  ;;  %v158_v46 = vld [vmem:[#allocation2] sm:$0xff] }
   0xd   :  { %v159_v53 = vld [vmem:[#allocation2 + $0x8] sm:$0xff] }
  0x76   :  { %v110_v9 = vpop.permute.xlu1 %109 }
  0x77   :  { %vm114_vm1 = vcmp.eq.s32.totalorder %v107_v8, %v110_v9  ;;  %v90_v10 = vpop.xlane.xlu0 %89 }
  0x78   :  { %v94_v11 = vsub.f32 %v83_v1, %v90_v10  ;;  %v116_v12 = vsel %vm114_vm1, %v83_v1, 0.0 }
  0x79   :  { %v118_v13 = vsel %vm87_vm0, %v116_v12, 0.0 }
  0x7a   :  { %v96_v14 = vmul.f32 1.442695, %v94_v11  ;;  %119 = vadd.xlane.f32.xlu0 %v118_v13 }
  0x7c   :  { %229 = vpow2.f32 %v96_v14 }
  0x7e   :  { %v113_v15 = vpop.permute.xlu1 %112 }
  0x7f   :  { %vm115_vm2 = vcmp.eq.s32.totalorder %v107_v8, %v113_v15  ;;  %v93_v16 = vpop.xlane.xlu0 %92 }
  0x80   :  { %v95_v17 = vsub.f32 %v84_v4, %v93_v16  ;;  %v117_v18 = vsel %vm115_vm2, %v84_v4, 0.0  ;;  %v271_v4 = vmov 16.0  }
  0x81   :  { %v121_v19 = vsel %vm87_vm0, %v117_v18, 0.0 }
  0x82   :  { %v230_v20 = vpop.eup %229  ;;  %v98_v21 = vmul.f32 1.442695, %v95_v17  ;;  %122 = vadd.xlane.f32.xlu1 %v121_v19 }
  0x83   :  { %v100_v22 = vsel %vm87_vm0, %v230_v20, 0.0 }
  0x84   :  { %231 = vpow2.f32 %v98_v21  ;;  %101 = vadd.xlane.f32.xlu2 %v100_v22 }
  0x8a   :  { %v232_v23 = vpop.eup %231 }
  0x8b   :  { %v103_v24 = vsel %vm87_vm0, %v232_v23, 0.0 }
  0x8c   :  { %104 = vadd.xlane.f32.xlu2 %v103_v24 }
  0xed   :  { %v120_v27 = vpop.xlane.xlu0 %119 }
  0xee   :  { %v124_v29 = vsub.f32 %v90_v10, %v120_v27 }
  0xf5   :  { %v123_v34 = vpop.xlane.xlu1 %122 }
  0xf6   :  { %v125_v37 = vsub.f32 %v93_v16, %v123_v34 }
  0xf7   :  { %v102_v26 = vpop.xlane.xlu2 %101 }
  0xf8   :  { %233 = vlog2.f32 %v102_v26 }
  0xfe   :  { %v234_v28 = vpop.eup %233 }
  0xff   :  { %v127_v30 = vmul.f32 0.6931472, %v234_v28  ;;  %v105_v31 = vpop.xlane.xlu2 %104 }
 0x100   :  { %235 = vlog2.f32 %v105_v31 }
 0x101   :  { %v130_v32 = vadd.f32 %v127_v30, %v124_v29 }
 0x103   :  { %v132_v33 = vsub.f32 0.0, %v130_v32 }
 0x105   :  { %v134_v35 = vmul.f32 1.442695, %v132_v33 }
 0x106   :  { %v236_v36 = vpop.eup %235 }
 0x107   :  { %237 = vpow2.f32 %v134_v35  ;;  %v129_v38 = vmul.f32 0.6931472, %v236_v36 }
 0x109   :  { %v131_v39 = vadd.f32 %v129_v38, %v125_v37 }
 0x10b   :  { %v133_v40 = vsub.f32 0.0, %v131_v39 }
 0x10d   :  { %v238_v41 = vpop.eup %237  ;;  %v136_v42 = vmul.f32 1.442695, %v133_v40 }
 0x10e   :  { %v138_v43 = vsub.f32 1.0, %v238_v41 }
 0x10f   :  { %239 = vpow2.f32 %v136_v42 }
 0x110   :  { %v140_v44 = vmax.f32 %v138_v43, 0.0  ;;  %241 = vrcp.f32 %v271_v4 }
 0x112   :  { %v142_v45 = vmul.f32 %v140_v44, %v140_v44 }
 0x114   :  { %v144_v47 = vmul.f32 %v142_v45, %v130_v32 }
 0x115   :  { %v240_v48 = vpop.eup %239 }
 0x116   :  { %v160_v49 = vadd.f32 %v158_v46, %v144_v47  ;;  %v139_v50 = vsub.f32 1.0, %v240_v48  ;;  %v242_v5 = vpop.eup %241 }
 0x117   :  { %v184_v6 = vmul.f32 16.0, %v242_v5  ;;  %vm188_vm4 = vweird.f32 %v242_v5 }
 0x118   :  { %163 = vst.msk [vmem:[#allocation2] sm:$0xff] %vm80_vm3, %v160_v49  ;;  %v141_v51 = vmax.f32 %v139_v50, 0.0 }
 0x119   :  { %v185_v7 = vsub.f32 1.0, %v184_v6 }
 0x11a   :  { %v143_v52 = vmul.f32 %v141_v51, %v141_v51 }
 0x11b   :  { %v186_v8 = vmul.f32 %v242_v5, %v185_v7 }
 0x11c   :  { %v145_v54 = vmul.f32 %v143_v52, %v131_v39 }
 0x11d   :  { %v187_v9 = vadd.f32 %v242_v5, %v186_v8 }
 0x11e   :  { %v161_v55 = vadd.f32 %v159_v53, %v145_v54 }
 0x11f   :  { %v168_v56 = vld [vmem:[#allocation2] sm:$0xff]  ;;  %v189_v10 = vsel %vm188_vm4, %v242_v5, %v187_v9 }
 0x120   :  { %164 = vst.msk [vmem:[#allocation2 + $0x8] sm:$0xff] %vm80_vm3, %v161_v55  ;;  %v170_v58 = vsel %vm80_vm3, %v168_v56, 0.0 }
 0x127   :  { %v169_v57 = vld [vmem:[#allocation2 + $0x8] sm:$0xff] }
 0x128   :  { %v171_v59 = vsel %vm80_vm3, %v169_v57, 0.0 }
 0x129   :  { %v172_v60 = vadd.f32 %v171_v59, %v170_v58 }
 0x12b   :  { %173 = vadd.xlane.f32.xlu2 %v172_v60 }
 0x19e   :  { %v174_v61 = vpop.xlane.xlu2 %173 }
 0x19f   :  { %v175_v62 = vrot.slane %v174_v61, 4 }
 0x1a1   :  { %v176_v63 = vadd.f32 %v175_v62, %v174_v61 }
 0x1a3   :  { %v177_v0 = vrot.slane %v176_v63, 2 }
 0x1a5   :  { %v178_v1 = vadd.f32 %v177_v0, %v176_v63 }
 0x1a7   :  { %v179_v2 = vrot.slane %v178_v1, 1 }
 0x1a9   :  { %v180_v3 = vadd.f32 %v179_v2, %v178_v1 }
 0x1ab   :  { %221 = vpush %v180_v3 }
 0x1dc   :  { %s222_s20 = spop %221 }
 0x1dd   :  { %v182_v11 = vstv %s222_s20 }
 0x1de   :  { %v190_v12 = vmul.f32 %v189_v10, %v182_v11 }
 0x1e0   :  { %192 = vst.msk [vmem:[#allocation3] sm:$0x1] %vm191_vm5, %v190_v12 }
 0x1e1   :  { %203 = dma.vmem_to_hbm [thread:$0]  %s199_s1, 16, %s201_s19, [#allocation4]  }
 0x1e2   :  { %267 = dma.done.wait [#allocation4], 16  }
 0x1e3   :  { %268 = vsyncadd [#allocation4], 4294967280 }
 0x1e4   :  { %208 = vsyncpa [#allocation4], 1 }

</bundles_post_ra>
